<compile_context>
chip_gen: v5e
topology: v5e:2x2
jax: 0.10.0
libtpu: 0.0.40
codegen_flags: <defaults>
</compile_context>

<pallas_src>
import functools

import jax
import jax.numpy as jnp
from jax.experimental import pallas as pl
from jax.experimental.pallas import tpu as pltpu


def _attention_kernel(x_ref, wqkv_ref, wp_ref, bp_ref, o_ref, qkv_ref, ctx_ref,
                      *, num_heads):
    """One batch element (sequence) per grid step.

    x_ref   : (1, N, C) bf16 input tokens
    wqkv_ref: (C, 3C)   bf16 fused [q*scale | k | v] weight, (in, out) layout
    wp_ref  : (C, C)    bf16 output-projection weight, (in, out) layout
    bp_ref  : (1, C)    f32  output-projection bias
    o_ref   : (1, N, C) output
    qkv_ref : (N, 3C)   bf16 VMEM scratch (fused projection result)
    ctx_ref : (N, C)    bf16 VMEM scratch (heads re-assembled, lane-contiguous)
    """
    x = x_ref[0]                                   # (N, C) bf16
    N, C = x.shape
    H = num_heads
    D = C // H

    # Fused QKV projection: one wide matmul, f32 accumulation on the MXU,
    # a single cast back to bf16 (q columns are pre-scaled by head_dim**-0.5).
    qkv_ref[...] = jnp.dot(
        x, wqkv_ref[...], preferred_element_type=jnp.float32
    ).astype(jnp.bfloat16)                         # (N, 3C) bf16

    # Per-head scaled-dot-product attention (H is small & static -> unrolled).
    for h in range(H):
        q_h = qkv_ref[:, h * D:(h + 1) * D]                    # (N, D) bf16
        k_h = qkv_ref[:, C + h * D:C + (h + 1) * D]            # (N, D) bf16
        v_h = qkv_ref[:, 2 * C + h * D:2 * C + (h + 1) * D]    # (N, D) bf16

        # Scores: contraction over the last dim of both operands (no explicit
        # transpose), f32 accumulation.
        s = jnp.einsum('nd,md->nm', q_h, k_h,
                       preferred_element_type=jnp.float32)     # (N, N) f32
        s = s - jnp.max(s, axis=-1, keepdims=True)
        p = jnp.exp(s)                                          # f32 numerator
        l = jnp.sum(p, axis=-1, keepdims=True)                  # (N, 1) f32

        ctx_h = jnp.dot(p.astype(jnp.bfloat16), v_h,
                        preferred_element_type=jnp.float32)     # (N, D) f32
        # Normalize the small (N, D) context, not the (N, N) probabilities.
        # approx=False keeps agreement with the f32 reference tight; the cost
        # difference is negligible at these sizes.
        ctx_h = ctx_h * pl.reciprocal(l, approx=False)

        # torch: (attn @ v).transpose(1, 2).reshape(B, N, C) puts head h at
        # columns [h*D, (h+1)*D) -> assemble a lane-contiguous ctx in scratch.
        ctx_ref[:, h * D:(h + 1) * D] = ctx_h.astype(jnp.bfloat16)

    # Fused output projection: one (N, C) x (C, C) matmul + bias (f32).
    out = jnp.dot(ctx_ref[...], wp_ref[...],
                  preferred_element_type=jnp.float32) + bp_ref[...]
    o_ref[0] = out.astype(o_ref.dtype)


def attention_forward(x, wq_t, wkv_t, wp_t, bp, *, num_heads):
    """x: (B, N, C). Linear weights stored pre-transposed as (in, out)."""
    B, N, C = x.shape
    H = num_heads
    D = C // H
    scale = D ** (-0.5)
    out_dtype = x.dtype

    # --- host/XLA-side weight prep (outside the kernel, cheap) -------------
    # Fused (in, out) QKV weight. Columns: [0, C) = q (scale folded),
    # [C, 2C) = k, [2C, 3C) = v — matching torch's kv reshape order.
    wqkv = jnp.concatenate([wq_t * scale, wkv_t], axis=1)       # (C, 3C)

    # bf16 MXU inputs (f32 accumulation inside the kernel); bias stays f32.
    x_bf = x.astype(jnp.bfloat16)
    wqkv_bf = wqkv.astype(jnp.bfloat16)
    wp_bf = wp_t.astype(jnp.bfloat16)
    bp2 = bp.reshape(1, C).astype(jnp.float32)

    kernel = functools.partial(_attention_kernel, num_heads=H)

    # Advisory cost estimate for XLA scheduling around the custom call.
    flops = (2 * B * N * C * (3 * C)        # fused qkv projection
             + 4 * B * H * N * N * D        # scores + PV matmuls
             + 2 * B * N * C * C)           # fused output projection
    transcendentals = B * H * N * N         # softmax exp
    bytes_accessed = (B * N * C * 2         # x (bf16)
                      + C * 3 * C * 2       # fused qkv weight (bf16)
                      + C * C * 2           # proj weight (bf16)
                      + C * 4               # bias (f32)
                      + B * N * C * 4)      # output (f32)

    return pl.pallas_call(
        kernel,
        out_shape=jax.ShapeDtypeStruct((B, N, C), out_dtype),
        grid=(B,),
        in_specs=[
            pl.BlockSpec((1, N, C), lambda b: (b, 0, 0)),       # x
            pl.BlockSpec((C, 3 * C), lambda b: (0, 0)),         # fused qkv w
            pl.BlockSpec((C, C), lambda b: (0, 0)),             # proj weight
            pl.BlockSpec((1, C), lambda b: (0, 0)),             # proj bias
        ],
        out_specs=pl.BlockSpec((1, N, C), lambda b: (b, 0, 0)),
        scratch_shapes=[
            pltpu.VMEM((N, 3 * C), jnp.bfloat16),               # qkv scratch
            pltpu.VMEM((N, C), jnp.bfloat16),                   # ctx scratch
        ],
        compiler_params=pltpu.CompilerParams(
            dimension_semantics=("parallel",),
            vmem_limit_bytes=32 * 1024 * 1024),
        cost_estimate=pl.CostEstimate(
            flops=flops,
            transcendentals=transcendentals,
            bytes_accessed=bytes_accessed),
    )(x_bf, wqkv_bf, wp_bf, bp2)


def _trunc_normal(key, shape, std=0.02):
    # timm-style trunc_normal_: truncated at [-2, 2], scaled by std.
    return jax.random.truncated_normal(key, -2.0, 2.0, shape, jnp.float32) * std


if __name__ == "__main__":
    # Small shapes consistent with the module: dim=32, num_heads=8 -> head_dim=4.
    B, N, C = 2, 8, 32
    num_heads = 8

    root = jax.random.PRNGKey(0)
    kx, kq, kkv, kp = jax.random.split(root, 4)

    x = jax.random.normal(kx, (B, N, C), jnp.float32)

    # Deterministic parameter init (shapes from nn.Linear in __init__).
    # PyTorch Linear weights are (out, in); we store the transpose (in, out).
    wq_t = _trunc_normal(kq, (C, C))          # q: Linear(dim, dim, bias=False)
    wkv_t = _trunc_normal(kkv, (C, 2 * C))    # kv: Linear(dim, 2*dim, bias=False)
    wp_t = _trunc_normal(kp, (C, C))          # proj: Linear(dim, dim)
    bp = jnp.zeros((C,), jnp.float32)         # proj bias init to 0

    out = attention_forward(x, wq_t, wkv_t, wp_t, bp, num_heads=num_heads)
    jax.block_until_ready(out)

    assert out.shape == (B, N, C)
    assert out.dtype == jnp.float32
    print("KERNEL_OK")
</pallas_src>

<mosaic_0001>
module attributes {stable_mosaic.version = 11 : i64} {
  func.func @_attention_kernel(%arg0: i32, %arg1: memref<1x8x32xbf16, #tpu.memory_space<vmem>>, %arg2: memref<32x96xbf16, #tpu.memory_space<vmem>>, %arg3: memref<32x32xbf16, #tpu.memory_space<vmem>>, %arg4: memref<1x32xf32, #tpu.memory_space<vmem>>, %arg5: memref<1x8x32xf32, #tpu.memory_space<vmem>>, %arg6: memref<8x96xbf16, #tpu.memory_space<vmem>>, %arg7: memref<8x32xbf16, #tpu.memory_space<vmem>>) attributes {dimension_semantics = [#tpu.dimension_semantics<parallel>], iteration_bounds = array<i64: 2>, scalar_prefetch = 0 : i64, scratch_operands = 2 : i64, tpu.core_type = #tpu.core_type<tc>, window_params = [{transform_indices = @transform_0, window_bounds = array<i64: 1, 8, 32>}, {pipeline_mode = #tpu.pipeline_mode<synchronous>, transform_indices = @transform_1, window_bounds = array<i64: 32, 96>}, {pipeline_mode = #tpu.pipeline_mode<synchronous>, transform_indices = @transform_2, window_bounds = array<i64: 32, 32>}, {pipeline_mode = #tpu.pipeline_mode<synchronous>, transform_indices = @transform_3, window_bounds = array<i64: 1, 32>}, {transform_indices = @transform_4, window_bounds = array<i64: 1, 8, 32>}]} {
    %c0 = arith.constant 0 : index
    %c0_0 = arith.constant 0 : index
    %c0_1 = arith.constant 0 : index
    %0 = vector.load %arg1[%c0, %c0_0, %c0_1] : memref<1x8x32xbf16, #tpu.memory_space<vmem>>, vector<1x8x32xbf16>
    %1 = vector.shape_cast %0 : vector<1x8x32xbf16> to vector<8x32xbf16>
    %c0_2 = arith.constant 0 : index
    %c0_3 = arith.constant 0 : index
    %2 = vector.load %arg2[%c0_2, %c0_3] : memref<32x96xbf16, #tpu.memory_space<vmem>>, vector<32x96xbf16>
    %cst = arith.constant dense<0.000000e+00> : vector<8x96xf32>
    %3 = tpu.matmul %1, %2, %cst {dimension_numbers = #tpu.dot_dimension_numbers<[1], [0], [0], [1], [0, 0, 1, 1], [], []>} : vector<8x32xbf16>, vector<32x96xbf16>, vector<8x96xf32> -> vector<8x96xf32>
    %4 = arith.truncf %3 : vector<8x96xf32> to vector<8x96xbf16>
    %c0_4 = arith.constant 0 : index
    %c0_5 = arith.constant 0 : index
    %5 = vector.load %arg6[%c0_4, %c0_5] : memref<8x96xbf16, #tpu.memory_space<vmem>>, vector<8x96xbf16>
    tpu.vector_store %arg6[%c0_4, %c0_5], %4 {strides = array<i32>} : memref<8x96xbf16, #tpu.memory_space<vmem>>, vector<8x96xbf16>,
    %c0_6 = arith.constant 0 : index
    %c0_7 = arith.constant 0 : index
    %6 = vector.load %arg6[%c0_6, %c0_7] : memref<8x96xbf16, #tpu.memory_space<vmem>>, vector<8x4xbf16>
    %c0_8 = arith.constant 0 : index
    %c32 = arith.constant 32 : index
    %7 = vector.load %arg6[%c0_8, %c32] : memref<8x96xbf16, #tpu.memory_space<vmem>>, vector<8x4xbf16>
    %c0_9 = arith.constant 0 : index
    %c64 = arith.constant 64 : index
    %8 = vector.load %arg6[%c0_9, %c64] : memref<8x96xbf16, #tpu.memory_space<vmem>>, vector<8x4xbf16>
    "tpu.trace_start"() <{level = 10 : i32, message = "nd,md->nm"}> : () -> ()
    %cst_10 = arith.constant dense<0.000000e+00> : vector<8x8xf32>
    %9 = tpu.matmul %6, %7, %cst_10 {dimension_numbers = #tpu.dot_dimension_numbers<[1], [1], [0], [0], [0, 0, 1, 0], [], []>} : vector<8x4xbf16>, vector<8x4xbf16>, vector<8x8xf32> -> vector<8x8xf32>
    "tpu.trace_stop"() : () -> ()
    %cst_11 = arith.constant dense<0xFF800000> : vector<8xf32>
    %10 = vector.multi_reduction <maximumf>, %9, %cst_11 [1] : vector<8x8xf32> to vector<8xf32>
    %11 = vector.shape_cast %10 : vector<8xf32> to vector<8x1xf32>
    %12 = vector.broadcast %11 : vector<8x1xf32> to vector<8x8xf32>
    %13 = arith.subf %9, %12 : vector<8x8xf32>
    %14 = math.exp %13 : vector<8x8xf32>
    %cst_12 = arith.constant dense<0.000000e+00> : vector<8xf32>
    %15 = vector.multi_reduction <add>, %14, %cst_12 [1] : vector<8x8xf32> to vector<8xf32>
    %16 = vector.shape_cast %15 : vector<8xf32> to vector<8x1xf32>
    %17 = arith.truncf %14 : vector<8x8xf32> to vector<8x8xbf16>
    %cst_13 = arith.constant dense<0.000000e+00> : vector<8x4xf32>
    %18 = tpu.matmul %17, %8, %cst_13 {dimension_numbers = #tpu.dot_dimension_numbers<[1], [0], [0], [1], [0, 0, 1, 1], [], []>} : vector<8x8xbf16>, vector<8x4xbf16>, vector<8x4xf32> -> vector<8x4xf32>
    %19 = tpu.reciprocal %16 : vector<8x1xf32> -> vector<8x1xf32>
    %20 = vector.broadcast %19 : vector<8x1xf32> to vector<8x4xf32>
    %21 = arith.mulf %18, %20 : vector<8x4xf32>
    %22 = arith.truncf %21 : vector<8x4xf32> to vector<8x4xbf16>
    %c0_14 = arith.constant 0 : index
    %c0_15 = arith.constant 0 : index
    %23 = vector.load %arg7[%c0_14, %c0_15] : memref<8x32xbf16, #tpu.memory_space<vmem>>, vector<8x4xbf16>
    tpu.vector_store %arg7[%c0_14, %c0_15], %22 {strides = array<i32>} : memref<8x32xbf16, #tpu.memory_space<vmem>>, vector<8x4xbf16>,
    %c0_16 = arith.constant 0 : index
    %c4 = arith.constant 4 : index
    %24 = vector.load %arg6[%c0_16, %c4] : memref<8x96xbf16, #tpu.memory_space<vmem>>, vector<8x4xbf16>
    %c0_17 = arith.constant 0 : index
    %c36 = arith.constant 36 : index
    %25 = vector.load %arg6[%c0_17, %c36] : memref<8x96xbf16, #tpu.memory_space<vmem>>, vector<8x4xbf16>
    %c0_18 = arith.constant 0 : index
    %c68 = arith.constant 68 : index
    %26 = vector.load %arg6[%c0_18, %c68] : memref<8x96xbf16, #tpu.memory_space<vmem>>, vector<8x4xbf16>
    "tpu.trace_start"() <{level = 10 : i32, message = "nd,md->nm"}> : () -> ()
    %cst_19 = arith.constant dense<0.000000e+00> : vector<8x8xf32>
    %27 = tpu.matmul %24, %25, %cst_19 {dimension_numbers = #tpu.dot_dimension_numbers<[1], [1], [0], [0], [0, 0, 1, 0], [], []>} : vector<8x4xbf16>, vector<8x4xbf16>, vector<8x8xf32> -> vector<8x8xf32>
    "tpu.trace_stop"() : () -> ()
    %cst_20 = arith.constant dense<0xFF800000> : vector<8xf32>
    %28 = vector.multi_reduction <maximumf>, %27, %cst_20 [1] : vector<8x8xf32> to vector<8xf32>
    %29 = vector.shape_cast %28 : vector<8xf32> to vector<8x1xf32>
    %30 = vector.broadcast %29 : vector<8x1xf32> to vector<8x8xf32>
    %31 = arith.subf %27, %30 : vector<8x8xf32>
    %32 = math.exp %31 : vector<8x8xf32>
    %cst_21 = arith.constant dense<0.000000e+00> : vector<8xf32>
    %33 = vector.multi_reduction <add>, %32, %cst_21 [1] : vector<8x8xf32> to vector<8xf32>
    %34 = vector.shape_cast %33 : vector<8xf32> to vector<8x1xf32>
    %35 = arith.truncf %32 : vector<8x8xf32> to vector<8x8xbf16>
    %cst_22 = arith.constant dense<0.000000e+00> : vector<8x4xf32>
    %36 = tpu.matmul %35, %26, %cst_22 {dimension_numbers = #tpu.dot_dimension_numbers<[1], [0], [0], [1], [0, 0, 1, 1], [], []>} : vector<8x8xbf16>, vector<8x4xbf16>, vector<8x4xf32> -> vector<8x4xf32>
    %37 = tpu.reciprocal %34 : vector<8x1xf32> -> vector<8x1xf32>
    %38 = vector.broadcast %37 : vector<8x1xf32> to vector<8x4xf32>
    %39 = arith.mulf %36, %38 : vector<8x4xf32>
    %40 = arith.truncf %39 : vector<8x4xf32> to vector<8x4xbf16>
    %c0_23 = arith.constant 0 : index
    %c4_24 = arith.constant 4 : index
    %41 = vector.load %arg7[%c0_23, %c4_24] : memref<8x32xbf16, #tpu.memory_space<vmem>>, vector<8x4xbf16>
    tpu.vector_store %arg7[%c0_23, %c4_24], %40 {strides = array<i32>} : memref<8x32xbf16, #tpu.memory_space<vmem>>, vector<8x4xbf16>,
    %c0_25 = arith.constant 0 : index
    %c8 = arith.constant 8 : index
    %42 = vector.load %arg6[%c0_25, %c8] : memref<8x96xbf16, #tpu.memory_space<vmem>>, vector<8x4xbf16>
    %c0_26 = arith.constant 0 : index
    %c40 = arith.constant 40 : index
    %43 = vector.load %arg6[%c0_26, %c40] : memref<8x96xbf16, #tpu.memory_space<vmem>>, vector<8x4xbf16>
    %c0_27 = arith.constant 0 : index
    %c72 = arith.constant 72 : index
    %44 = vector.load %arg6[%c0_27, %c72] : memref<8x96xbf16, #tpu.memory_space<vmem>>, vector<8x4xbf16>
    "tpu.trace_start"() <{level = 10 : i32, message = "nd,md->nm"}> : () -> ()
    %cst_28 = arith.constant dense<0.000000e+00> : vector<8x8xf32>
    %45 = tpu.matmul %42, %43, %cst_28 {dimension_numbers = #tpu.dot_dimension_numbers<[1], [1], [0], [0], [0, 0, 1, 0], [], []>} : vector<8x4xbf16>, vector<8x4xbf16>, vector<8x8xf32> -> vector<8x8xf32>
    "tpu.trace_stop"() : () -> ()
    %cst_29 = arith.constant dense<0xFF800000> : vector<8xf32>
    %46 = vector.multi_reduction <maximumf>, %45, %cst_29 [1] : vector<8x8xf32> to vector<8xf32>
    %47 = vector.shape_cast %46 : vector<8xf32> to vector<8x1xf32>
    %48 = vector.broadcast %47 : vector<8x1xf32> to vector<8x8xf32>
    %49 = arith.subf %45, %48 : vector<8x8xf32>
    %50 = math.exp %49 : vector<8x8xf32>
    %cst_30 = arith.constant dense<0.000000e+00> : vector<8xf32>
    %51 = vector.multi_reduction <add>, %50, %cst_30 [1] : vector<8x8xf32> to vector<8xf32>
    %52 = vector.shape_cast %51 : vector<8xf32> to vector<8x1xf32>
    %53 = arith.truncf %50 : vector<8x8xf32> to vector<8x8xbf16>
    %cst_31 = arith.constant dense<0.000000e+00> : vector<8x4xf32>
    %54 = tpu.matmul %53, %44, %cst_31 {dimension_numbers = #tpu.dot_dimension_numbers<[1], [0], [0], [1], [0, 0, 1, 1], [], []>} : vector<8x8xbf16>, vector<8x4xbf16>, vector<8x4xf32> -> vector<8x4xf32>
    %55 = tpu.reciprocal %52 : vector<8x1xf32> -> vector<8x1xf32>
    %56 = vector.broadcast %55 : vector<8x1xf32> to vector<8x4xf32>
    %57 = arith.mulf %54, %56 : vector<8x4xf32>
    %58 = arith.truncf %57 : vector<8x4xf32> to vector<8x4xbf16>
    %c0_32 = arith.constant 0 : index
    %c8_33 = arith.constant 8 : index
    %59 = vector.load %arg7[%c0_32, %c8_33] : memref<8x32xbf16, #tpu.memory_space<vmem>>, vector<8x4xbf16>
    tpu.vector_store %arg7[%c0_32, %c8_33], %58 {strides = array<i32>} : memref<8x32xbf16, #tpu.memory_space<vmem>>, vector<8x4xbf16>,
    %c0_34 = arith.constant 0 : index
    %c12 = arith.constant 12 : index
    %60 = vector.load %arg6[%c0_34, %c12] : memref<8x96xbf16, #tpu.memory_space<vmem>>, vector<8x4xbf16>
    %c0_35 = arith.constant 0 : index
    %c44 = arith.constant 44 : index
    %61 = vector.load %arg6[%c0_35, %c44] : memref<8x96xbf16, #tpu.memory_space<vmem>>, vector<8x4xbf16>
    %c0_36 = arith.constant 0 : index
    %c76 = arith.constant 76 : index
    %62 = vector.load %arg6[%c0_36, %c76] : memref<8x96xbf16, #tpu.memory_space<vmem>>, vector<8x4xbf16>
    "tpu.trace_start"() <{level = 10 : i32, message = "nd,md->nm"}> : () -> ()
    %cst_37 = arith.constant dense<0.000000e+00> : vector<8x8xf32>
    %63 = tpu.matmul %60, %61, %cst_37 {dimension_numbers = #tpu.dot_dimension_numbers<[1], [1], [0], [0], [0, 0, 1, 0], [], []>} : vector<8x4xbf16>, vector<8x4xbf16>, vector<8x8xf32> -> vector<8x8xf32>
    "tpu.trace_stop"() : () -> ()
    %cst_38 = arith.constant dense<0xFF800000> : vector<8xf32>
    %64 = vector.multi_reduction <maximumf>, %63, %cst_38 [1] : vector<8x8xf32> to vector<8xf32>
    %65 = vector.shape_cast %64 : vector<8xf32> to vector<8x1xf32>
    %66 = vector.broadcast %65 : vector<8x1xf32> to vector<8x8xf32>
    %67 = arith.subf %63, %66 : vector<8x8xf32>
    %68 = math.exp %67 : vector<8x8xf32>
    %cst_39 = arith.constant dense<0.000000e+00> : vector<8xf32>
    %69 = vector.multi_reduction <add>, %68, %cst_39 [1] : vector<8x8xf32> to vector<8xf32>
    %70 = vector.shape_cast %69 : vector<8xf32> to vector<8x1xf32>
    %71 = arith.truncf %68 : vector<8x8xf32> to vector<8x8xbf16>
    %cst_40 = arith.constant dense<0.000000e+00> : vector<8x4xf32>
    %72 = tpu.matmul %71, %62, %cst_40 {dimension_numbers = #tpu.dot_dimension_numbers<[1], [0], [0], [1], [0, 0, 1, 1], [], []>} : vector<8x8xbf16>, vector<8x4xbf16>, vector<8x4xf32> -> vector<8x4xf32>
    %73 = tpu.reciprocal %70 : vector<8x1xf32> -> vector<8x1xf32>
    %74 = vector.broadcast %73 : vector<8x1xf32> to vector<8x4xf32>
    %75 = arith.mulf %72, %74 : vector<8x4xf32>
    %76 = arith.truncf %75 : vector<8x4xf32> to vector<8x4xbf16>
    %c0_41 = arith.constant 0 : index
    %c12_42 = arith.constant 12 : index
    %77 = vector.load %arg7[%c0_41, %c12_42] : memref<8x32xbf16, #tpu.memory_space<vmem>>, vector<8x4xbf16>
    tpu.vector_store %arg7[%c0_41, %c12_42], %76 {strides = array<i32>} : memref<8x32xbf16, #tpu.memory_space<vmem>>, vector<8x4xbf16>,
    %c0_43 = arith.constant 0 : index
    %c16 = arith.constant 16 : index
    %78 = vector.load %arg6[%c0_43, %c16] : memref<8x96xbf16, #tpu.memory_space<vmem>>, vector<8x4xbf16>
    %c0_44 = arith.constant 0 : index
    %c48 = arith.constant 48 : index
    %79 = vector.load %arg6[%c0_44, %c48] : memref<8x96xbf16, #tpu.memory_space<vmem>>, vector<8x4xbf16>
    %c0_45 = arith.constant 0 : index
    %c80 = arith.constant 80 : index
    %80 = vector.load %arg6[%c0_45, %c80] : memref<8x96xbf16, #tpu.memory_space<vmem>>, vector<8x4xbf16>
    "tpu.trace_start"() <{level = 10 : i32, message = "nd,md->nm"}> : () -> ()
    %cst_46 = arith.constant dense<0.000000e+00> : vector<8x8xf32>
    %81 = tpu.matmul %78, %79, %cst_46 {dimension_numbers = #tpu.dot_dimension_numbers<[1], [1], [0], [0], [0, 0, 1, 0], [], []>} : vector<8x4xbf16>, vector<8x4xbf16>, vector<8x8xf32> -> vector<8x8xf32>
    "tpu.trace_stop"() : () -> ()
    %cst_47 = arith.constant dense<0xFF800000> : vector<8xf32>
    %82 = vector.multi_reduction <maximumf>, %81, %cst_47 [1] : vector<8x8xf32> to vector<8xf32>
    %83 = vector.shape_cast %82 : vector<8xf32> to vector<8x1xf32>
    %84 = vector.broadcast %83 : vector<8x1xf32> to vector<8x8xf32>
    %85 = arith.subf %81, %84 : vector<8x8xf32>
    %86 = math.exp %85 : vector<8x8xf32>
    %cst_48 = arith.constant dense<0.000000e+00> : vector<8xf32>
    %87 = vector.multi_reduction <add>, %86, %cst_48 [1] : vector<8x8xf32> to vector<8xf32>
    %88 = vector.shape_cast %87 : vector<8xf32> to vector<8x1xf32>
    %89 = arith.truncf %86 : vector<8x8xf32> to vector<8x8xbf16>
    %cst_49 = arith.constant dense<0.000000e+00> : vector<8x4xf32>
    %90 = tpu.matmul %89, %80, %cst_49 {dimension_numbers = #tpu.dot_dimension_numbers<[1], [0], [0], [1], [0, 0, 1, 1], [], []>} : vector<8x8xbf16>, vector<8x4xbf16>, vector<8x4xf32> -> vector<8x4xf32>
    %91 = tpu.reciprocal %88 : vector<8x1xf32> -> vector<8x1xf32>
    %92 = vector.broadcast %91 : vector<8x1xf32> to vector<8x4xf32>
    %93 = arith.mulf %90, %92 : vector<8x4xf32>
    %94 = arith.truncf %93 : vector<8x4xf32> to vector<8x4xbf16>
    %c0_50 = arith.constant 0 : index
    %c16_51 = arith.constant 16 : index
    %95 = vector.load %arg7[%c0_50, %c16_51] : memref<8x32xbf16, #tpu.memory_space<vmem>>, vector<8x4xbf16>
    tpu.vector_store %arg7[%c0_50, %c16_51], %94 {strides = array<i32>} : memref<8x32xbf16, #tpu.memory_space<vmem>>, vector<8x4xbf16>,
    %c0_52 = arith.constant 0 : index
    %c20 = arith.constant 20 : index
    %96 = vector.load %arg6[%c0_52, %c20] : memref<8x96xbf16, #tpu.memory_space<vmem>>, vector<8x4xbf16>
    %c0_53 = arith.constant 0 : index
    %c52 = arith.constant 52 : index
    %97 = vector.load %arg6[%c0_53, %c52] : memref<8x96xbf16, #tpu.memory_space<vmem>>, vector<8x4xbf16>
    %c0_54 = arith.constant 0 : index
    %c84 = arith.constant 84 : index
    %98 = vector.load %arg6[%c0_54, %c84] : memref<8x96xbf16, #tpu.memory_space<vmem>>, vector<8x4xbf16>
    "tpu.trace_start"() <{level = 10 : i32, message = "nd,md->nm"}> : () -> ()
    %cst_55 = arith.constant dense<0.000000e+00> : vector<8x8xf32>
    %99 = tpu.matmul %96, %97, %cst_55 {dimension_numbers = #tpu.dot_dimension_numbers<[1], [1], [0], [0], [0, 0, 1, 0], [], []>} : vector<8x4xbf16>, vector<8x4xbf16>, vector<8x8xf32> -> vector<8x8xf32>
    "tpu.trace_stop"() : () -> ()
    %cst_56 = arith.constant dense<0xFF800000> : vector<8xf32>
    %100 = vector.multi_reduction <maximumf>, %99, %cst_56 [1] : vector<8x8xf32> to vector<8xf32>
    %101 = vector.shape_cast %100 : vector<8xf32> to vector<8x1xf32>
    %102 = vector.broadcast %101 : vector<8x1xf32> to vector<8x8xf32>
    %103 = arith.subf %99, %102 : vector<8x8xf32>
    %104 = math.exp %103 : vector<8x8xf32>
    %cst_57 = arith.constant dense<0.000000e+00> : vector<8xf32>
    %105 = vector.multi_reduction <add>, %104, %cst_57 [1] : vector<8x8xf32> to vector<8xf32>
    %106 = vector.shape_cast %105 : vector<8xf32> to vector<8x1xf32>
    %107 = arith.truncf %104 : vector<8x8xf32> to vector<8x8xbf16>
    %cst_58 = arith.constant dense<0.000000e+00> : vector<8x4xf32>
    %108 = tpu.matmul %107, %98, %cst_58 {dimension_numbers = #tpu.dot_dimension_numbers<[1], [0], [0], [1], [0, 0, 1, 1], [], []>} : vector<8x8xbf16>, vector<8x4xbf16>, vector<8x4xf32> -> vector<8x4xf32>
    %109 = tpu.reciprocal %106 : vector<8x1xf32> -> vector<8x1xf32>
    %110 = vector.broadcast %109 : vector<8x1xf32> to vector<8x4xf32>
    %111 = arith.mulf %108, %110 : vector<8x4xf32>
    %112 = arith.truncf %111 : vector<8x4xf32> to vector<8x4xbf16>
    %c0_59 = arith.constant 0 : index
    %c20_60 = arith.constant 20 : index
    %113 = vector.load %arg7[%c0_59, %c20_60] : memref<8x32xbf16, #tpu.memory_space<vmem>>, vector<8x4xbf16>
    tpu.vector_store %arg7[%c0_59, %c20_60], %112 {strides = array<i32>} : memref<8x32xbf16, #tpu.memory_space<vmem>>, vector<8x4xbf16>,
    %c0_61 = arith.constant 0 : index
    %c24 = arith.constant 24 : index
    %114 = vector.load %arg6[%c0_61, %c24] : memref<8x96xbf16, #tpu.memory_space<vmem>>, vector<8x4xbf16>
    %c0_62 = arith.constant 0 : index
    %c56 = arith.constant 56 : index
    %115 = vector.load %arg6[%c0_62, %c56] : memref<8x96xbf16, #tpu.memory_space<vmem>>, vector<8x4xbf16>
    %c0_63 = arith.constant 0 : index
    %c88 = arith.constant 88 : index
    %116 = vector.load %arg6[%c0_63, %c88] : memref<8x96xbf16, #tpu.memory_space<vmem>>, vector<8x4xbf16>
    "tpu.trace_start"() <{level = 10 : i32, message = "nd,md->nm"}> : () -> ()
    %cst_64 = arith.constant dense<0.000000e+00> : vector<8x8xf32>
    %117 = tpu.matmul %114, %115, %cst_64 {dimension_numbers = #tpu.dot_dimension_numbers<[1], [1], [0], [0], [0, 0, 1, 0], [], []>} : vector<8x4xbf16>, vector<8x4xbf16>, vector<8x8xf32> -> vector<8x8xf32>
    "tpu.trace_stop"() : () -> ()
    %cst_65 = arith.constant dense<0xFF800000> : vector<8xf32>
    %118 = vector.multi_reduction <maximumf>, %117, %cst_65 [1] : vector<8x8xf32> to vector<8xf32>
    %119 = vector.shape_cast %118 : vector<8xf32> to vector<8x1xf32>
    %120 = vector.broadcast %119 : vector<8x1xf32> to vector<8x8xf32>
    %121 = arith.subf %117, %120 : vector<8x8xf32>
    %122 = math.exp %121 : vector<8x8xf32>
    %cst_66 = arith.constant dense<0.000000e+00> : vector<8xf32>
    %123 = vector.multi_reduction <add>, %122, %cst_66 [1] : vector<8x8xf32> to vector<8xf32>
    %124 = vector.shape_cast %123 : vector<8xf32> to vector<8x1xf32>
    %125 = arith.truncf %122 : vector<8x8xf32> to vector<8x8xbf16>
    %cst_67 = arith.constant dense<0.000000e+00> : vector<8x4xf32>
    %126 = tpu.matmul %125, %116, %cst_67 {dimension_numbers = #tpu.dot_dimension_numbers<[1], [0], [0], [1], [0, 0, 1, 1], [], []>} : vector<8x8xbf16>, vector<8x4xbf16>, vector<8x4xf32> -> vector<8x4xf32>
    %127 = tpu.reciprocal %124 : vector<8x1xf32> -> vector<8x1xf32>
    %128 = vector.broadcast %127 : vector<8x1xf32> to vector<8x4xf32>
    %129 = arith.mulf %126, %128 : vector<8x4xf32>
    %130 = arith.truncf %129 : vector<8x4xf32> to vector<8x4xbf16>
    %c0_68 = arith.constant 0 : index
    %c24_69 = arith.constant 24 : index
    %131 = vector.load %arg7[%c0_68, %c24_69] : memref<8x32xbf16, #tpu.memory_space<vmem>>, vector<8x4xbf16>
    tpu.vector_store %arg7[%c0_68, %c24_69], %130 {strides = array<i32>} : memref<8x32xbf16, #tpu.memory_space<vmem>>, vector<8x4xbf16>,
    %c0_70 = arith.constant 0 : index
    %c28 = arith.constant 28 : index
    %132 = vector.load %arg6[%c0_70, %c28] : memref<8x96xbf16, #tpu.memory_space<vmem>>, vector<8x4xbf16>
    %c0_71 = arith.constant 0 : index
    %c60 = arith.constant 60 : index
    %133 = vector.load %arg6[%c0_71, %c60] : memref<8x96xbf16, #tpu.memory_space<vmem>>, vector<8x4xbf16>
    %c0_72 = arith.constant 0 : index
    %c92 = arith.constant 92 : index
    %134 = vector.load %arg6[%c0_72, %c92] : memref<8x96xbf16, #tpu.memory_space<vmem>>, vector<8x4xbf16>
    "tpu.trace_start"() <{level = 10 : i32, message = "nd,md->nm"}> : () -> ()
    %cst_73 = arith.constant dense<0.000000e+00> : vector<8x8xf32>
    %135 = tpu.matmul %132, %133, %cst_73 {dimension_numbers = #tpu.dot_dimension_numbers<[1], [1], [0], [0], [0, 0, 1, 0], [], []>} : vector<8x4xbf16>, vector<8x4xbf16>, vector<8x8xf32> -> vector<8x8xf32>
    "tpu.trace_stop"() : () -> ()
    %cst_74 = arith.constant dense<0xFF800000> : vector<8xf32>
    %136 = vector.multi_reduction <maximumf>, %135, %cst_74 [1] : vector<8x8xf32> to vector<8xf32>
    %137 = vector.shape_cast %136 : vector<8xf32> to vector<8x1xf32>
    %138 = vector.broadcast %137 : vector<8x1xf32> to vector<8x8xf32>
    %139 = arith.subf %135, %138 : vector<8x8xf32>
    %140 = math.exp %139 : vector<8x8xf32>
    %cst_75 = arith.constant dense<0.000000e+00> : vector<8xf32>
    %141 = vector.multi_reduction <add>, %140, %cst_75 [1] : vector<8x8xf32> to vector<8xf32>
    %142 = vector.shape_cast %141 : vector<8xf32> to vector<8x1xf32>
    %143 = arith.truncf %140 : vector<8x8xf32> to vector<8x8xbf16>
    %cst_76 = arith.constant dense<0.000000e+00> : vector<8x4xf32>
    %144 = tpu.matmul %143, %134, %cst_76 {dimension_numbers = #tpu.dot_dimension_numbers<[1], [0], [0], [1], [0, 0, 1, 1], [], []>} : vector<8x8xbf16>, vector<8x4xbf16>, vector<8x4xf32> -> vector<8x4xf32>
    %145 = tpu.reciprocal %142 : vector<8x1xf32> -> vector<8x1xf32>
    %146 = vector.broadcast %145 : vector<8x1xf32> to vector<8x4xf32>
    %147 = arith.mulf %144, %146 : vector<8x4xf32>
    %148 = arith.truncf %147 : vector<8x4xf32> to vector<8x4xbf16>
    %c0_77 = arith.constant 0 : index
    %c28_78 = arith.constant 28 : index
    %149 = vector.load %arg7[%c0_77, %c28_78] : memref<8x32xbf16, #tpu.memory_space<vmem>>, vector<8x4xbf16>
    tpu.vector_store %arg7[%c0_77, %c28_78], %148 {strides = array<i32>} : memref<8x32xbf16, #tpu.memory_space<vmem>>, vector<8x4xbf16>,
    %c0_79 = arith.constant 0 : index
    %c0_80 = arith.constant 0 : index
    %150 = vector.load %arg7[%c0_79, %c0_80] : memref<8x32xbf16, #tpu.memory_space<vmem>>, vector<8x32xbf16>
    %c0_81 = arith.constant 0 : index
    %c0_82 = arith.constant 0 : index
    %151 = vector.load %arg3[%c0_81, %c0_82] : memref<32x32xbf16, #tpu.memory_space<vmem>>, vector<32x32xbf16>
    %cst_83 = arith.constant dense<0.000000e+00> : vector<8x32xf32>
    %152 = tpu.matmul %150, %151, %cst_83 {dimension_numbers = #tpu.dot_dimension_numbers<[1], [0], [0], [1], [0, 0, 1, 1], [], []>} : vector<8x32xbf16>, vector<32x32xbf16>, vector<8x32xf32> -> vector<8x32xf32>
    %c0_84 = arith.constant 0 : index
    %c0_85 = arith.constant 0 : index
    %153 = vector.load %arg4[%c0_84, %c0_85] : memref<1x32xf32, #tpu.memory_space<vmem>>, vector<1x32xf32>
    %154 = vector.broadcast %153 : vector<1x32xf32> to vector<8x32xf32>
    %155 = arith.addf %152, %154 : vector<8x32xf32>
    %c0_86 = arith.constant 0 : index
    %c0_87 = arith.constant 0 : index
    %c0_88 = arith.constant 0 : index
    %156 = vector.load %arg5[%c0_86, %c0_87, %c0_88] : memref<1x8x32xf32, #tpu.memory_space<vmem>>, vector<1x8x32xf32>
    %157 = vector.shape_cast %156 : vector<1x8x32xf32> to vector<8x32xf32>
    %158 = vector.shape_cast %155 : vector<8x32xf32> to vector<1x8x32xf32>
    tpu.vector_store %arg5[%c0_86, %c0_87, %c0_88], %158 {strides = array<i32>} : memref<1x8x32xf32, #tpu.memory_space<vmem>>, vector<1x8x32xf32>,
    return
  }
  func.func @transform_0(%arg0: i32) -> (i32, i32, i32) {
    %c0_i32 = arith.constant 0 : i32
    %c0_i32_0 = arith.constant 0 : i32
    %c0_i32_1 = arith.constant 0 : i32
    return %arg0, %c0_i32, %c0_i32_0 : i32, i32, i32
  }
  func.func @transform_1(%arg0: i32) -> (i32, i32) {
    %c0_i32 = arith.constant 0 : i32
    %c0_i32_0 = arith.constant 0 : i32
    %c0_i32_1 = arith.constant 0 : i32
    return %c0_i32, %c0_i32_0 : i32, i32
  }
  func.func @transform_2(%arg0: i32) -> (i32, i32) {
    %c0_i32 = arith.constant 0 : i32
    %c0_i32_0 = arith.constant 0 : i32
    %c0_i32_1 = arith.constant 0 : i32
    return %c0_i32, %c0_i32_0 : i32, i32
  }
  func.func @transform_3(%arg0: i32) -> (i32, i32) {
    %c0_i32 = arith.constant 0 : i32
    %c0_i32_0 = arith.constant 0 : i32
    %c0_i32_1 = arith.constant 0 : i32
    return %c0_i32, %c0_i32_0 : i32, i32
  }
  func.func @transform_4(%arg0: i32) -> (i32, i32, i32) {
    %c0_i32 = arith.constant 0 : i32
    %c0_i32_0 = arith.constant 0 : i32
    %c0_i32_1 = arith.constant 0 : i32
    return %arg0, %c0_i32, %c0_i32_0 : i32, i32, i32
  }
}

</mosaic_0001>

<bundles_post_ra>
// kernel: tpu_custom_call.1
= control target key start
LH: loop header
LB: loop body
LE: loop exit
PB: predicated region body
PF: predicated region fallthrough
CT: control target
= control target key end

     0   :  { %9 = vsyncpa [#allocation5], 0  ;;  %s1718_s0 = inlined_call_operand.hbm [shape: bf16[2,8,32], index: 0, kind: input, shape index: {}]   ;;  %s1719_s1 = inlined_call_operand.hbm [shape: bf16[32,96], index: 1, kind: input, shape index: {}]   ;;  %s1720_s2 = inlined_call_operand.hbm [shape: bf16[32,32], index: 2, kind: input, shape index: {}]   ;;  %s1721_s3 = inlined_call_operand.vmem [shape: f32[1,32], index: 3, kind: input, shape index: {}]   ;;  %s1722_s4 = inlined_call_operand.hbm [shape: f32[2,8,32], index: 4, kind: output, shape index: {}]  }
   0x1   :  { %11 = vsyncpa [#allocation5 + $0x1], 0 }
   0x2   :  { %12 = vsyncpa [#allocation8], 0 }
   0x3   :  { %13 = vsyncpa [#allocation6], 0 }
   0x4   :  { %15 = vsyncpa [#allocation6 + $0x1], 0  ;;  %s1473_s15 = smov 0   ;;  %s1475_s16 = smov 0  }
   0x5   :  { %s1477_s17 = smov 0   ;;  %s1479_s18 = smov 0  }
   0x6 LB: > { %s152_s21 = sshll.u32 %s1719_s1, 4  ;;  %s1497_s22 = sadd.s32 4294967295, %s1412_s18   ;;  %s1412_s18 = sphi %s1479_s18, %s1733_s18   ;;  %s1408_s17 = sphi %s1477_s17, %s1732_s17   ;;  %s1404_s16 = sphi %s1475_s16, %s1731_s16   ;;  %s1400_s15 = sphi %s1473_s15, %s1730_s15   ;;  %s153_s21 = int_to_ptr.hbm [resolvable:$true] %s152_s21 }
   0x7   : > { %p1067_p0 = scmp.ge.s32.totalorder %s1412_s18, 1  ;;  %p42_p1 = scmp.eq.s32.totalorder %s1497_s22, 0 }
   0x8   : > { %p141_p2 = scmp.lt.s32.totalorder %s1412_s18, 3  ;;  %s1414_s24 = smov [#allocation7]  }
   0x9   : > { %s154_s25 = sshll.u32 %s1414_s24, 4  ;;  %s166_s28 = sshll.u32 %s1720_s2, 4  ;;  %s155_s25 = int_to_ptr.vmem [resolvable:$true] %s154_s25  ;;  %s167_s28 = int_to_ptr.hbm [resolvable:$true] %s166_s28 }
   0xa   : > { %p1502_p3 = pnand %p1067_p0, %p141_p2  ;;  %s1415_s29 = smov [#allocation9]  }
   0xb   : > { %s168_s30 = sshll.u32 %s1415_s29, 4  ;;  %s1416_s5 = smov 64   ;;  %s169_s30 = int_to_ptr.vmem [resolvable:$true] %s168_s30 }
   0xc   : > { %p1132_p4 = pneg %p1502_p3  ;;  %s1417_s6 = smov 4  }
   0xd   : > { %s1066_s7 = sadd.s32 4294967294, %s1412_s18   ;;  %s1516_s8 = sadd.s32 1, %s1412_s18  }
   0xe   : > { %p1133_p6 = pnand %p1132_p4, %p42_p1  ;;  %s25_s9 = ssub.s32 %s1412_s18, %s1516_s8 }
   0xf   : > { %s28_s10 = sadd.s32 1, %s1408_s17  ;;  %p26_p7 = scmp.eq.s32.totalorder %s25_s9, 0 }
  0x10   : > { %1135 = dma.hbm_to_vmem [thread:$0]  (!%p1133_p6), %s153_s21, 256, %s155_s25, [#allocation8], %s1416_s5, %s1416_s5, %s1417_s6  }
  0x11   : > { %1138 = dma.hbm_to_vmem [thread:$0]  (!%p1133_p6), %s167_s28, 256, %s169_s30, [#allocation8], %s1416_s5, %s1416_s5, %s1417_s6  }
  0x12   : > { %p35_p8 = scmp.ne.s32.totalorder %s1408_s17, %s1404_s16  ;;  %p36_p9 = scmp.eq.s32.totalorder %s1412_s18, 0 }
  0x13   : > { %p41_p10 = scmp.ne.s32.totalorder %s1404_s16, %s1400_s15  ;;  %p128_p13 = scmp.eq.s32.totalorder %s1497_s22, 1 }
  0x14   : > { %s1527_s11 = scalar_select %p26_p7, %s1408_s17, %s28_s10  }
  0x15   : > { %p1529_p11 = por %p36_p9, %p35_p8  ;;  %p1535_p12 = por %p42_p1, %p41_p10 }
  0x16   : > { %p134_p0 = scmp.eq.s32.totalorder %s1066_s7, 1  ;;  %p1149_p2 = scmp.lt.s32.totalorder %s1412_s18, 2 }
  0x17   : > { %s185_s14 = sand.u32 1, %s1408_s17   ;;  %p1542_p4 = por %p128_p13, %p35_p8 }
  0x18   : > { %p1546_p6 = por %p134_p0, %p41_p10  ;;  %s1071_s21 = sshll.u32 %s185_s14, 2 }
  0x19   : > { %s1072_s24 = sshll.u32 %s1412_s18, 2  ;;  %s189_s28 = scalar_lea.vmem [#allocation4], %s1071_s21 }
  0x1a   : > { %s193_s27 = scalar_lea.hbm %s1718_s0, %s1072_s24  ;;  %s197_s29 = sshll.u32 %s189_s28, 4  ;;  %s198_s29 = int_to_ptr.vmem [resolvable:$true] %s197_s29 }
  0x1b   : > { %s195_s30 = sshll.u32 %s193_s27, 4  ;;  %p1556_p7 = pnand %p1149_p2, %p1529_p11  ;;  %s196_s30 = int_to_ptr.hbm [resolvable:$true] %s195_s30 }
  0x1c   : > { %s186_s6 = scalar_lea.sflag [#allocation5], %s185_s14  ;;  %s1312_s7 = sshra.s32 %s196_s30, 4  ;;  %s1313_s7 = int_to_ptr.hbm [resolvable:$true] %s1312_s7 }
  0x1d   : > { %s1314_s9 = scalar_lea.hbm %s1313_s7, 4  ;;  %p1316_p9 = pneg %p1556_p7 }
  0x1e   : > { %p1315_p8 = scmp.ne.s32.totalorder %s1313_s7, %s1314_s9  ;;  %s1319_s24 = scalar_lea.hbm %s1718_s0, 8 }
  0x1f   : > { %p1320_p11 = scmp.lt.s32.totalorder %s1313_s7, %s1718_s0  ;;  %p1321_p0 = scmp.lt.s32.totalorder %s1319_s24, %s1314_s9 }
  0x20   : > { %p1317_p10 = pnand %p1316_p9, %p1315_p8 }
  0x21   : > { %p1322_p2 = por %p1321_p0, %p1320_p11 }
  0x22   : > { %p1318_p13 = pneg %p1317_p10 }
  0x24   : > { %p1323_p5 = pnand %p1322_p2, %p1318_p13 }
  0x26   : > { %1326 = shalt.err (!%p1323_p5)
}
  0x27   : > { %1142 = dma.hbm_to_vmem [thread:$0]  (!%p1556_p7), %s196_s30, 64, %s198_s29, %s186_s6  }
  0x28   : > { %206 = sbr.rel (%p1502_p3) target bundleno = 1099 (0x44b), region = 36  ;;  %s1573_s14 = sand.u32 (!%p1502_p3), 1, %s1404_s16  }
  0x29   : > { %s1074_s26 = sshll.u32 (!%p1502_p3), %s1573_s14, 2  ;;  %s209_s27 = scalar_lea.sflag (!%p1502_p3), [#allocation5], %s1573_s14 }
  0x2a   : > { %s212_s28 = scalar_lea.vmem (!%p1502_p3), [#allocation4], %s1074_s26 }
  0x2d   : > { %1387 = dma.done.wait (%p1535_p12), %s209_s27, 64  }
  0x2e   : > { %1389 = vsyncadd (%p1535_p12), %s209_s27, 4294967232 }
  0x2f   : > { %1391 = dma.done.wait (%p42_p1), [#allocation8], 512  }
  0x30   : > { %1393 = vsyncadd (%p42_p1), [#allocation8], 4294966784  ;;  %v1117_v0 = vld [vmem:[#allocation7 + $0x8] sm:$0xff]  ;;  %v1116_v1 = vld [vmem:[#allocation7] sm:$0xff]  ;;  %vm266_vm0 = vcmask 261120   ;;  %vm284_vm1 = vcmask 781312  }
  0x31   : > { %276 = vmatpush.bf16.msra.mxu0 %v1117_v0  ;;  %v249_v2 = vld [vmem:[%s212_s28] sm:$0xf]  ;;  %s1418_s23 = smov 116   ;;  %s1419_s13 = smov 124   ;;  %vm292_vm2 = vcmask 31744   ;;  %vm328_vm3 = vcmask 1043456  }
  0x32   : > { %s1420_s29 = smov 96   ;;  %s1421_s30 = smov 88   ;;  %vm312_vm4 = vcmask 64512  }
  0x33   : > { %s1422_s5 = smov 84   ;;  %s1423_s6 = smov 92  }
  0x34   : > { %s1424_s7 = smov 108   ;;  %s1425_s9 = smov 120  }
  0x35   : > { %277 = vmatpush.bf16.msra.mxu0 %v1116_v1  ;;  %s1426_s10 = smov 76   ;;  %s1427_s21 = smov 112  }
  0x36   : > { %s1428_s24 = smov 68   ;;  %s1429_s25 = smov 80  }
  0x37   : > { %s1430_s12 = smov 104   ;;  %s1431_s26 = smov 72  }
  0x38   : > { %1086 = vmatmul.msk.bf16.vlgmr.msra.gmra.mxu0 %vm266_vm0, %v249_v2  ;;  %s1432_s27 = smov 100   ;;  %s1433_s28 = smov 56  }
  0xb5   : > { %v279_v3 = vpop.f32.mrf.mxu0 }
  0xb6   : > { %v283_v4 = vpack.c.bf16 %v279_v3, %v279_v3 }
  0xb8   : > { %285 = vst.msk [vmem:[#allocation2] sm:$0xf] %vm284_vm1, %v283_v4 }
  0xbd   : > { %v281_v5 = vpop.f32.mrf.mxu0 }
  0xbf   : > { %v523_v6 = vld [vmem:[#allocation2] sm:$0xf] }
  0xc0   : > { %v363_v7 = vld [vmem:[#allocation2] sm:$0xf]  ;;  %v525_v9 = vunpack.c.l.b16 %v523_v6 }
  0xc1   : > { %v1586_v8 = vld [vmem:[#allocation2] sm:$0xf]  ;;  %v365_v10 = vunpack.c.l.b16 %v363_v7 }
  0xc2   : > { %v288_v11 = vunpack.c.l.b16 %v1586_v8  ;;  %v1589_v12 = vpack.c.b16 %v525_v9, %v525_v9  ;;  %v443_v15 = vld [vmem:[#allocation2] sm:$0xf] }
  0xc3   : > { %v366_v13 = vpack.c.b16 %v365_v10, %v365_v10  ;;  %v445_v16 = vunpack.c.l.b16 %v443_v15  ;;  %v683_v18 = vld [vmem:[#allocation2] sm:$0xf] }
  0xc4   : > { %v289_v14 = vpack.c.b16 %v288_v11, %v288_v11  ;;  %527 = vrot.lane.b32.xlu2 %v1589_v12, %s1418_s23  ;;  %v685_v19 = vunpack.c.l.b16 %v683_v18  ;;  %v603_v21 = vld [vmem:[#allocation2] sm:$0xf]  ;;  %s1434_s23 = smov 64  }
  0xc5   : > { %367 = vrot.lane.b32.xlu1 %v366_v13, %s1419_s13  ;;  %v446_v17 = vpack.c.b16 %v445_v16, %v445_v16  ;;  %v843_v22 = vld [vmem:[#allocation2] sm:$0xf]  ;;  %v605_v23 = vunpack.c.l.b16 %v603_v21  ;;  %s1435_s13 = smov 60  }
  0xc6   : > { %290 = vrot.lane.b32.xlu0 %v289_v14, %s1420_s29  ;;  %v1593_v20 = vpack.c.b16 %v685_v19, %v685_v19  ;;  %v845_v24 = vunpack.c.l.b16 %v843_v22  ;;  %v763_v27 = vld [vmem:[#allocation2] sm:$0xf]  ;;  %s1436_s29 = smov 52  }
  0xc7   : > { %v1597_v25 = vpack.c.b16 %v605_v23, %v605_v23  ;;  %v765_v28 = vunpack.c.l.b16 %v763_v27 }
  0xc8   : > { %v1599_v26 = vpack.c.b16 %v845_v24, %v845_v24 }
  0xc9   : > { %v1604_v29 = vpack.c.b16 %v765_v28, %v765_v28 }
  0xcc   : > { %449 = vrot.lane.b32.xlu2 %v446_v17, %s1421_s30  ;;  %s1437_s30 = smov 48  }
  0xcd   : > { %529 = vrot.lane.b32.xlu1 %v1589_v12, %s1422_s5  ;;  %s1438_s5 = smov 44  }
  0xce   : > { %369 = vrot.lane.b32.xlu0 %v366_v13, %s1423_s6  ;;  %s1439_s6 = smov 36  }
  0xd4   : > { %687 = vrot.lane.b32.xlu2 %v1593_v20, %s1424_s7  ;;  %s1440_s7 = smov 40  }
  0xd5   : > { %447 = vrot.lane.b32.xlu1 %v446_v17, %s1425_s9  ;;  %s1441_s9 = smov 8  }
  0xd6   : > { %689 = vrot.lane.b32.xlu0 %v1593_v20, %s1426_s10  ;;  %s1442_s10 = smov 4  }
  0xdc   : > { %607 = vrot.lane.b32.xlu2 %v1597_v25, %s1427_s21  ;;  %s1443_s21 = smov 12  }
  0xdd   : > { %849 = vrot.lane.b32.xlu1 %v1599_v26, %s1428_s24  ;;  %s1444_s24 = smov 16  }
  0xde   : > { %609 = vrot.lane.b32.xlu0 %v1597_v25, %s1429_s25  ;;  %s1445_s25 = smov 24  }
  0xe4   : > { %767 = vrot.lane.b32.xlu2 %v1604_v29, %s1430_s12  ;;  %s1446_s12 = smov 20  }
  0xe5   : > { %769 = vrot.lane.b32.xlu1 %v1604_v29, %s1431_s26  ;;  %s1447_s26 = smov 28  }
  0xe6   : > { %847 = vrot.lane.b32.xlu0 %v1599_v26, %s1432_s27  ;;  %s1113_s27 = sshll.u32 %s1497_s22, 3  ;;  %s962_s22 = scalar_lea.sflag [#allocation6], %s1573_s14 }
  0xec   : > { %480 = vrot.lane.b32.xlu2 %v446_v17, %s1433_s28  ;;  %s1077_s28 = sshll.u32 %s1573_s14, 3 }
  0xed   : > { %323 = vrot.lane.b32.xlu1 %v289_v14, %s1434_s23 }
  0xf5   : > { %400 = vrot.lane.b32.xlu1 %v366_v13, %s1435_s13 }
 0x11e   : > { %v528_v30 = vpop.permute.xlu2 %527 }
 0x126   : > { %v450_v31 = vpop.permute.xlu2 %449 }
 0x127   : > { %v455_v32 = vsel %vm292_vm2, %v450_v31, 0 }
 0x128   : > { %464 = vmatpush.bf16.xpose.msrb.mxu0 %v455_v32 }
 0x12e   : > { %v688_v33 = vpop.permute.xlu2 %687 }
 0x136   : > { %v608_v34 = vpop.permute.xlu2 %607 }
 0x137   : > { %v368_v35 = vpop.permute.xlu1 %367 }
 0x138   : > { %v291_v36 = vpop.permute.xlu0 %290 }
 0x139   : > { %v297_v37 = vsel %vm292_vm2, %v291_v36, 0 }
 0x13a   : > { %306 = vmatpush.bf16.xpose.msra.mxu1 %v297_v37 }
 0x13e   : > { %v768_v38 = vpop.permute.xlu2 %767 }
 0x13f   : > { %v530_v39 = vpop.permute.xlu1 %529 }
 0x140   : > { %v370_v40 = vpop.permute.xlu0 %369  ;;  %v535_v41 = vsel %vm292_vm2, %v530_v39, 0 }
 0x141   : > { %1087 = vmatmul.msk.bf16.vlgmr.msra.gmra.mxu1 %vm292_vm2, %v1586_v8  ;;  %v375_v42 = vsel %vm292_vm2, %v370_v40, 0 }
 0x142   : > { %384 = vmatpush.bf16.xpose.msra.mxu3 %v375_v42 }
 0x146   : > { %v481_v43 = vpop.permute.xlu2 %480 }
 0x147   : > { %v448_v44 = vpop.permute.xlu1 %447  ;;  %v486_v46 = vsel %vm328_vm3, %v481_v43, 0 }
 0x148   : > { %v690_v45 = vpop.permute.xlu0 %689  ;;  %1091 = vmatmul.msk.bf16.vlgmr.msrb.gmra.mxu0 %vm292_vm2, %v448_v44  ;;  %495 = vmatpush.bf16.msrb.mxu1 %v486_v46 }
 0x149   : > { %v695_v47 = vsel %vm292_vm2, %v690_v45, 0  ;;  %1089 = vmatmul.msk.bf16.vlgmr.msra.gmra.mxu3 %vm292_vm2, %v368_v35 }
 0x14a   : > { %544 = vmatpush.bf16.xpose.msrb.mxu3 %v535_v41 }
 0x14f   : > { %v850_v48 = vpop.permute.xlu1 %849 }
 0x150   : > { %v610_v49 = vpop.permute.xlu0 %609  ;;  %v855_v53 = vsel %vm292_vm2, %v850_v48, 0 }
 0x151   : > { %v615_v50 = vsel %vm292_vm2, %v610_v49, 0 }
 0x152   : > { %704 = vmatpush.bf16.xpose.msra.mxu3 %v695_v47  ;;  %624 = vmatpush.bf16.xpose.msra.mxu0 %v615_v50 }
 0x157   : > { %v770_v51 = vpop.permute.xlu1 %769 }
 0x158   : > { %v775_v52 = vsel %vm292_vm2, %v770_v51, 0  ;;  %v848_v58 = vpop.permute.xlu0 %847 }
 0x159   : > { %1093 = vmatmul.msk.bf16.vlgmr.msrb.gmra.mxu3 %vm292_vm2, %v528_v30  ;;  %1095 = vmatmul.msk.bf16.vlgmr.msra.gmra.mxu0 %vm292_vm2, %v608_v34 }
 0x15a   : > { %864 = vmatpush.bf16.xpose.msrb.mxu3 %v855_v53  ;;  %784 = vmatpush.bf16.xpose.msrb.mxu0 %v775_v52 }
 0x15f   : > { %v324_v54 = vpop.permute.xlu1 %323 }
 0x160   : > { %v330_v55 = vsel %vm328_vm3, %v324_v54, 0 }
 0x161   : > { %339 = vmatpush.bf16.msra.mxu2 %v330_v55 }
 0x167   : > { %v401_v56 = vpop.permute.xlu1 %400 }
 0x168   : > { %v406_v57 = vsel %vm328_vm3, %v401_v56, 0 }
 0x169   : > { %1097 = vmatmul.msk.bf16.vlgmr.msra.gmra.mxu3 %vm292_vm2, %v688_v33  ;;  %1099 = vmatmul.msk.bf16.vlgmr.msrb.gmra.mxu0 %vm292_vm2, %v768_v38 }
 0x16a   : > { %415 = vmatpush.bf16.msrb.mxu2 %v406_v57 }
 0x179   : > { %1101 = vmatmul.msk.bf16.vlgmr.msrb.gmra.mxu3 %vm292_vm2, %v848_v58 }
 0x1be   : > { %v308_v59 = vpop.f32.mrf.mxu1 }
 0x1bf   : > { %v313_v60 = vsel %vm312_vm4, %v308_v59, -inf }
 0x1c0   : > { %314 = vmax.xlane.f32.xlu0 %v313_v60 }
 0x1c5   : > { %v466_v61 = vpop.f32.mrf.mxu0 }
 0x1c6   : > { %v310_v62 = vpop.f32.mrf.mxu1  ;;  %v470_v63 = vsel %vm312_vm4, %v466_v61, -inf }
 0x1c7   : > { %471 = vmax.xlane.f32.xlu2 %v470_v63 }
 0x1cc   : > { %v386_v0 = vpop.f32.mrf.mxu3 }
 0x1cd   : > { %v468_v1 = vpop.f32.mrf.mxu0  ;;  %v390_v2 = vsel %vm312_vm4, %v386_v0, -inf }
 0x1cf   : > { %391 = vmax.xlane.f32.xlu2 %v390_v2 }
 0x1d4   : > { %560 = vrot.lane.b32.xlu0 %v1589_v12, %s1436_s29  ;;  %v388_v3 = vpop.f32.mrf.mxu3  ;;  %s972_s29 = scalar_lea.hbm %s1722_s4, %s1113_s27 }
 0x1d6   : > { %v1633_v4 = vpop.f32.mrf.mxu0 }
 0x1d7   : > { %v630_v15 = vsel %vm312_vm4, %v1633_v4, -inf }
 0x1dc   : > { %v546_v5 = vpop.f32.mrf.mxu3 }
 0x1dd   : > { %v550_v6 = vsel %vm312_vm4, %v546_v5, -inf }
 0x1de   : > { %551 = vmax.xlane.f32.xlu1 %v550_v6  ;;  %v628_v7 = vpop.f32.mrf.mxu0 }
 0x1e4   : > { %v548_v8 = vpop.f32.mrf.mxu3 }
 0x1e6   : > { %v1636_v9 = vpop.f32.mrf.mxu0 }
 0x1e7   : > { %640 = vrot.lane.b32.xlu2 %v1597_v25, %s1437_s30  ;;  %v790_v18 = vsel %vm312_vm4, %v1636_v9, -inf }
 0x1ec   : > { %v1639_v10 = vpop.f32.mrf.mxu3 }
 0x1ed   : > { %v710_v11 = vsel %vm312_vm4, %v1639_v10, -inf }
 0x1ee   : > { %711 = vmax.xlane.f32.xlu1 %v710_v11  ;;  %v788_v12 = vpop.f32.mrf.mxu0 }
 0x1f4   : > { %v708_v13 = vpop.f32.mrf.mxu3 }
 0x1fc   : > { %v1643_v14 = vpop.f32.mrf.mxu3 }
 0x1fd   : > { %v870_v17 = vsel %vm312_vm4, %v1643_v14, -inf }
 0x1fe   : > { %631 = vmax.xlane.f32.xlu0 %v630_v15 }
 0x204   : > { %v868_v16 = vpop.f32.mrf.mxu3 }
 0x207   : > { %720 = vrot.lane.b32.xlu1 %v1593_v20, %s1438_s5 }
 0x210   : > { %871 = vmax.xlane.f32.xlu2 %v870_v17 }
 0x212   : > { %880 = vrot.lane.b32.xlu0 %v1599_v26, %s1439_s6  ;;  %s247_s6 = scalar_lea.vmem [#allocation10], %s1077_s28 }
 0x228   : > { %800 = vrot.lane.b32.xlu2 %v1604_v29, %s1440_s7  ;;  %s974_s7 = sshll.u32 %s247_s6, 4  ;;  %s975_s7 = int_to_ptr.vmem [resolvable:$true] %s974_s7 }
 0x231   : > { %791 = vmax.xlane.f32.xlu1 %v790_v18 }
 0x233   : > { %v315_v19 = vpop.xlane.xlu0 %314 }
 0x234   : > { %v316_v21 = vsub.f32 %v308_v59, %v315_v19 }
 0x236   : > { %v317_v22 = vmul.f32 1.442695, %v316_v21 }
 0x238   : > { %1220 = vpow2.f32 %v317_v22 }
 0x23a   : > { %v472_v23 = vpop.xlane.xlu2 %471 }
 0x23b   : > { %v473_v20 = vsub.f32 %v466_v61, %v472_v23 }
 0x23d   : > { %v474_v24 = vmul.f32 1.442695, %v473_v20 }
 0x23e   : > { %v1221_v25 = vpop.eup %1220 }
 0x23f   : > { %1222 = vpow2.f32 %v474_v24  ;;  %v322_v27 = vpack.c.bf16 %v1221_v25, %v1221_v25  ;;  %v319_v43 = vsel %vm312_vm4, %v1221_v25, 0.0 }
 0x241   : > { %1088 = vmatmul.msk.bf16.vlgmr.msra.gmra.mxu2 %vm312_vm4, %v322_v27 }
 0x242   : > { %v392_v26 = vpop.xlane.xlu2 %391 }
 0x243   : > { %v393_v28 = vsub.f32 %v386_v0, %v392_v26 }
 0x245   : > { %v1223_v30 = vpop.eup %1222  ;;  %v394_v29 = vmul.f32 1.442695, %v393_v28 }
 0x246   : > { %v561_v31 = vpop.permute.xlu0 %560  ;;  %v476_v32 = vsel %vm312_vm4, %v1223_v30, 0.0  ;;  %v479_v33 = vpack.c.bf16 %v1223_v30, %v1223_v30 }
 0x247   : > { %1224 = vpow2.f32 %v394_v29  ;;  %v566_v34 = vsel %vm328_vm3, %v561_v31, 0  ;;  %477 = vadd.xlane.f32.xlu1 %v476_v32 }
 0x248   : > { %575 = vmatpush.bf16.msra.mxu2 %v566_v34  ;;  %1092 = vmatmul.msk.bf16.vlgmr.msrb.gmra.mxu1 %vm312_vm4, %v479_v33 }
 0x24a   : > { %v641_v35 = vpop.permute.xlu2 %640 }
 0x24b   : > { %v646_v36 = vsel %vm328_vm3, %v641_v35, 0 }
 0x24c   : > { %655 = vmatpush.bf16.msra.mxu1 %v646_v36 }
 0x24d   : > { %v1225_v37 = vpop.eup %1224 }
 0x24e   : > { %v396_v38 = vsel %vm312_vm4, %v1225_v37, 0.0  ;;  %v399_v39 = vpack.c.bf16 %v1225_v37, %v1225_v37 }
 0x24f   : > { %397 = vadd.xlane.f32.xlu0 %v396_v38 }
 0x251   : > { %v552_v40 = vpop.xlane.xlu1 %551  ;;  %1090 = vmatmul.msk.bf16.vlgmr.msrb.gmra.mxu2 %vm312_vm4, %v399_v39 }
 0x252   : > { %v553_v41 = vsub.f32 %v546_v5, %v552_v40 }
 0x254   : > { %v554_v42 = vmul.f32 1.442695, %v553_v41 }
 0x256   : > { %1226 = vpow2.f32 %v554_v42 }
 0x257   : > { %320 = vadd.xlane.f32.xlu0 %v319_v43 }
 0x25c   : > { %v1227_v44 = vpop.eup %1226 }
 0x25d   : > { %v556_v45 = vsel %vm312_vm4, %v1227_v44, 0.0  ;;  %v559_v46 = vpack.c.bf16 %v1227_v44, %v1227_v44 }
 0x25e   : > { %557 = vadd.xlane.f32.xlu1 %v556_v45 }
 0x261   : > { %1094 = vmatmul.msk.bf16.vlgmr.msra.gmra.mxu2 %vm312_vm4, %v559_v46  ;;  %v712_v47 = vpop.xlane.xlu1 %711 }
 0x262   : > { %v713_v48 = vsub.f32 %v1639_v10, %v712_v47 }
 0x264   : > { %v714_v49 = vmul.f32 1.442695, %v713_v48 }
 0x266   : > { %1228 = vpow2.f32 %v714_v49 }
 0x26c   : > { %v1229_v53 = vpop.eup %1228 }
 0x26d   : > { %v719_v57 = vpack.c.bf16 %v1229_v53, %v1229_v53  ;;  %v716_v12 = vsel %vm312_vm4, %v1229_v53, 0.0 }
 0x271   : > { %v632_v50 = vpop.xlane.xlu0 %631 }
 0x272   : > { %v633_v51 = vsub.f32 %v1633_v4, %v632_v50 }
 0x274   : > { %v634_v52 = vmul.f32 1.442695, %v633_v51 }
 0x276   : > { %1230 = vpow2.f32 %v634_v52 }
 0x279   : > { %v721_v54 = vpop.permute.xlu1 %720 }
 0x27a   : > { %v726_v55 = vsel %vm328_vm3, %v721_v54, 0 }
 0x27b   : > { %735 = vmatpush.bf16.msrb.mxu2 %v726_v55 }
 0x27c   : > { %v1231_v56 = vpop.eup %1230 }
 0x27d   : > { %v639_v58 = vpack.c.bf16 %v1231_v56, %v1231_v56  ;;  %v636_v59 = vsel %vm312_vm4, %v1231_v56, 0.0 }
 0x27e   : > { %1098 = vmatmul.msk.bf16.vlgmr.msrb.gmra.mxu2 %vm312_vm4, %v719_v57  ;;  %637 = vadd.xlane.f32.xlu2 %v636_v59 }
 0x27f   : > { %1096 = vmatmul.msk.bf16.vlgmr.msra.gmra.mxu1 %vm312_vm4, %v639_v58 }
 0x283   : > { %v872_v60 = vpop.xlane.xlu2 %871 }
 0x284   : > { %v873_v61 = vsub.f32 %v1643_v14, %v872_v60  ;;  %v881_v62 = vpop.permute.xlu0 %880 }
 0x285   : > { %v886_v63 = vsel %vm328_vm3, %v881_v62, 0 }
 0x286   : > { %v874_v0 = vmul.f32 1.442695, %v873_v61  ;;  %895 = vmatpush.bf16.msra.mxu2 %v886_v63 }
 0x288   : > { %1232 = vpow2.f32 %v874_v0 }
 0x28b   : > { %v801_v1 = vpop.permute.xlu2 %800 }
 0x28c   : > { %v806_v2 = vsel %vm328_vm3, %v801_v1, 0  ;;  %vm361_vm3 = vcmask 27648  }
 0x28d   : > { %815 = vmatpush.bf16.msrb.mxu1 %v806_v2 }
 0x28e   : > { %v1233_v3 = vpop.eup %1232 }
 0x28f   : > { %v879_v4 = vpack.c.bf16 %v1233_v3, %v1233_v3  ;;  %v876_v14 = vsel %vm312_vm4, %v1233_v3, 0.0 }
 0x291   : > { %1102 = vmatmul.msk.bf16.vlgmr.msra.gmra.mxu2 %vm312_vm4, %v879_v4 }
 0x2a4   : > { %v792_v5 = vpop.xlane.xlu1 %791 }
 0x2a5   : > { %v793_v6 = vsub.f32 %v1636_v9, %v792_v5 }
 0x2a7   : > { %v794_v7 = vmul.f32 1.442695, %v793_v6 }
 0x2a9   : > { %1234 = vpow2.f32 %v794_v7 }
 0x2af   : > { %v1235_v8 = vpop.eup %1234 }
 0x2b0   : > { %v799_v10 = vpack.c.bf16 %v1235_v8, %v1235_v8  ;;  %v796_v11 = vsel %vm312_vm4, %v1235_v8, 0.0 }
 0x2b1   : > { %797 = vadd.xlane.f32.xlu1 %v796_v11 }
 0x2b2   : > { %1100 = vmatmul.msk.bf16.vlgmr.msrb.gmra.mxu1 %vm312_vm4, %v799_v10 }
 0x2b9   : > { %717 = vadd.xlane.f32.xlu1 %v716_v12 }
 0x2ba   : > { %v478_v13 = vpop.xlane.xlu1 %477 }
 0x2bb   : > { %1236 = vrcp.f32 %v478_v13  ;;  %v512_v21 = vand.u32 2147483648, %v478_v13  ;;  %v510_v23 = vand.u32 2147483647, %v478_v13  ;;  %vm506_vm6 = vweird.f32 %v478_v13 }
 0x2bd   : > { %v513_v25 = vor.u32 1.1754944e-38, %v512_v21  ;;  %vm511_vm8 = vcmp.eq.f32.partialorder %v510_v23, 8.507059e+37 }
 0x2c1   : > { %v1237_v15 = vpop.eup %1236  ;;  %877 = vadd.xlane.f32.xlu1 %v876_v14 }
 0x2c2   : > { %v502_v16 = vmul.f32 %v1237_v15, %v478_v13  ;;  %v398_v9 = vpop.xlane.xlu0 %397  ;;  %vm507_vm5 = vweird.f32 %v1237_v15 }
 0x2c3   : > { %1238 = vrcp.f32 %v398_v9  ;;  %vm508_vm7 = vmor %vm506_vm6, %vm507_vm5  ;;  %v432_v34 = vand.u32 2147483648, %v398_v9  ;;  %v430_v37 = vand.u32 2147483647, %v398_v9  ;;  %vm426_vm10 = vweird.f32 %v398_v9 }
 0x2c4   : > { %v503_v17 = vsub.f32 1.0, %v502_v16  ;;  %v341_v18 = vpop.f32.mrf.mxu2 }
 0x2c5   : > { %v497_v19 = vpop.f32.mrf.mxu1  ;;  %v433_v41 = vor.u32 1.1754944e-38, %v432_v34  ;;  %vm431_vm12 = vcmp.eq.f32.partialorder %v430_v37, 8.507059e+37 }
 0x2c6   : > { %v504_v22 = vmul.f32 %v1237_v15, %v503_v17 }
 0x2c8   : > { %v505_v20 = vadd.f32 %v1237_v15, %v504_v22 }
 0x2c9   : > { %v1239_v24 = vpop.eup %1238 }
 0x2ca   : > { %v422_v27 = vmul.f32 %v1239_v24, %v398_v9  ;;  %v509_v26 = vsel %vm508_vm7, %v1237_v15, %v505_v20  ;;  %v321_v28 = vpop.xlane.xlu0 %320  ;;  %vm427_vm9 = vweird.f32 %v1239_v24 }
 0x2cb   : > { %v514_v30 = vsel %vm511_vm8, %v513_v25, %v509_v26  ;;  %1240 = vrcp.f32 %v321_v28  ;;  %vm428_vm11 = vmor %vm426_vm10, %vm427_vm9  ;;  %v356_v47 = vand.u32 2147483648, %v321_v28  ;;  %v354_v50 = vand.u32 2147483647, %v321_v28 }
 0x2cc   : > { %v423_v29 = vsub.f32 1.0, %v422_v27  ;;  %v515_v31 = vmul.f32 %v514_v30, %v497_v19  ;;  %v343_v32 = vpop.f32.mrf.mxu2  ;;  %vm350_vm14 = vweird.f32 %v321_v28 }
 0x2cd   : > { %v499_v33 = vpop.f32.mrf.mxu1  ;;  %v357_v54 = vor.u32 1.1754944e-38, %v356_v47  ;;  %vm355_vm1 = vcmp.eq.f32.partialorder %v354_v50, 8.507059e+37 }
 0x2ce   : > { %v516_v35 = vpack.c.bf16 %v515_v31, %v515_v31  ;;  %v424_v36 = vmul.f32 %v1239_v24, %v423_v29 }
 0x2d0   : > { %518 = vrot.lane.b32.xlu0 %v516_v35, %s1441_s9  ;;  %v425_v38 = vadd.f32 %v1239_v24, %v424_v36  ;;  %s976_s9 = sshll.u32 %s972_s29, 4  ;;  %s977_s9 = int_to_ptr.hbm [resolvable:$true] %s976_s9 }
 0x2d1   : > { %v1241_v39 = vpop.eup %1240  ;;  %v558_v40 = vpop.xlane.xlu1 %557 }
 0x2d2   : > { %v346_v42 = vmul.f32 %v1241_v39, %v321_v28  ;;  %1242 = vrcp.f32 %v558_v40  ;;  %v429_v43 = vsel %vm428_vm11, %v1239_v24, %v425_v38  ;;  %vm351_vm13 = vweird.f32 %v1241_v39 }
 0x2d3   : > { %v434_v44 = vsel %vm431_vm12, %v433_v41, %v429_v43  ;;  %vm352_vm15 = vmor %vm350_vm14, %vm351_vm13  ;;  %v592_v62 = vand.u32 2147483648, %v558_v40  ;;  %vm586_vm4 = vweird.f32 %v558_v40  ;;  %v590_v1 = vand.u32 2147483647, %v558_v40 }
 0x2d4   : > { %v347_v45 = vsub.f32 1.0, %v346_v42  ;;  %v417_v46 = vpop.f32.mrf.mxu2 }
 0x2d5   : > { %v435_v48 = vmul.f32 %v434_v44, %v417_v46  ;;  %v593_v3 = vor.u32 1.1754944e-38, %v592_v62  ;;  %vm591_vm6 = vcmp.eq.f32.partialorder %v590_v1, 8.507059e+37 }
 0x2d6   : > { %v348_v49 = vmul.f32 %v1241_v39, %v347_v45 }
 0x2d7   : > { %v436_v51 = vpack.c.bf16 %v435_v48, %v435_v48 }
 0x2d8   : > { %v1243_v52 = vpop.eup %1242  ;;  %v349_v53 = vadd.f32 %v1241_v39, %v348_v49 }
 0x2d9   : > { %v582_v55 = vmul.f32 %v1243_v52, %v558_v40  ;;  %vm587_vm2 = vweird.f32 %v1243_v52 }
 0x2da   : > { %v353_v56 = vsel %vm352_vm15, %v1241_v39, %v349_v53  ;;  %438 = vrot.lane.b32.xlu1 %v436_v51, %s1442_s10  ;;  %vm588_vm5 = vmor %vm586_vm4, %vm587_vm2  ;;  %s1356_s10 = sshra.s32 %s977_s9, 4  ;;  %s1357_s10 = int_to_ptr.hbm [resolvable:$true] %s1356_s10 }
 0x2db   : > { %v358_v57 = vsel %vm355_vm1, %v357_v54, %v353_v56  ;;  %v583_v58 = vsub.f32 1.0, %v582_v55  ;;  %p1363_p12 = scmp.lt.s32.totalorder %s1357_s10, %s1722_s4 }
 0x2dc   : > { %v359_v59 = vmul.f32 %v358_v57, %v341_v18  ;;  %v419_v60 = vpop.f32.mrf.mxu2 }
 0x2dd   : > { %v584_v61 = vmul.f32 %v1243_v52, %v583_v58 }
 0x2de   : > { %v360_v63 = vpack.c.bf16 %v359_v59, %v359_v59 }
 0x2df   : > { %v585_v0 = vadd.f32 %v1243_v52, %v584_v61 }
 0x2e0   : > { %362 = vst.msk [vmem:[#allocation3] sm:$0xf] %vm361_vm3, %v360_v63 }
 0x2e1   : > { %v589_v2 = vsel %vm588_vm5, %v1243_v52, %v585_v0 }
 0x2e2   : > { %v594_v5 = vsel %vm591_vm6, %v593_v3, %v589_v2 }
 0x2e4   : > { %v577_v4 = vpop.f32.mrf.mxu2 }
 0x2e5   : > { %v595_v6 = vmul.f32 %v594_v5, %v577_v4 }
 0x2e7   : > { %v596_v7 = vpack.c.bf16 %v595_v6, %v595_v6 }
 0x2e9   : > { %598 = vrot.lane.b32.xlu2 %v596_v7, %s1443_s21  ;;  %s1358_s21 = scalar_lea.hbm %s1357_s10, 8 }
 0x2ea   : > { %p1359_p1 = scmp.ne.s32.totalorder %s1357_s10, %s1358_s21 }
 0x2ec   : > { %v579_v8 = vpop.f32.mrf.mxu2  ;;  %p1360_p3 = pnand %p1359_p1, %p1542_p4 }
 0x2ee   : > { %p1361_p5 = pneg %p1360_p3 }
 0x2f1   : > { %v638_v10 = vpop.xlane.xlu2 %637 }
 0x2f2   : > { %1244 = vrcp.f32 %v638_v10  ;;  %v672_v15 = vand.u32 2147483648, %v638_v10  ;;  %v670_v9 = vand.u32 2147483647, %v638_v10  ;;  %vm666_vm8 = vweird.f32 %v638_v10 }
 0x2f4   : > { %v673_v18 = vor.u32 1.1754944e-38, %v672_v15  ;;  %vm671_vm10 = vcmp.eq.f32.partialorder %v670_v9, 8.507059e+37 }
 0x2f8   : > { %v1245_v11 = vpop.eup %1244 }
 0x2f9   : > { %v662_v12 = vmul.f32 %v1245_v11, %v638_v10  ;;  %vm667_vm7 = vweird.f32 %v1245_v11  ;;  %v1119_v10 = vld [vmem:[#allocation9 + $0x8] sm:$0xff] }
 0x2fa   : > { %vm668_vm9 = vmor %vm666_vm8, %vm667_vm7  ;;  %vm441_vm8 = vcmask 60448   ;;  %953 = vmatpush.bf16.msra.mxu0 %v1119_v10 }
 0x2fb   : > { %v663_v13 = vsub.f32 1.0, %v662_v12 }
 0x2fc   : > { %v657_v14 = vpop.f32.mrf.mxu1 }
 0x2fd   : > { %v664_v16 = vmul.f32 %v1245_v11, %v663_v13 }
 0x2ff   : > { %v665_v17 = vadd.f32 %v1245_v11, %v664_v16  ;;  %v1219_v16 = vld [vmem:[%s1721_s3] ss:$0 sm:$0xff] }
 0x301   : > { %v669_v19 = vsel %vm668_vm9, %v1245_v11, %v665_v17  ;;  %v737_v21 = vpop.f32.mrf.mxu2  ;;  %vm521_vm9 = vcmask 93248   ;;  %v1118_v11 = vld [vmem:[#allocation9] sm:$0xff] }
 0x302   : > { %v674_v22 = vsel %vm671_vm10, %v673_v18, %v669_v19  ;;  %vm601_vm10 = vcmask 126048   ;;  %954 = vmatpush.bf16.msra.mxu0 %v1118_v11 }
 0x303   : > { %v675_v23 = vmul.f32 %v674_v22, %v657_v14 }
 0x304   : > { %v659_v20 = vpop.f32.mrf.mxu1 }
 0x305   : > { %v676_v24 = vpack.c.bf16 %v675_v23, %v675_v23 }
 0x307   : > { %678 = vrot.lane.b32.xlu0 %v676_v24, %s1444_s24 }
 0x309   : > { %v739_v25 = vpop.f32.mrf.mxu2 }
 0x314   : > { %v897_v27 = vpop.f32.mrf.mxu2 }
 0x31c   : > { %v899_v26 = vpop.f32.mrf.mxu2 }
 0x324   : > { %v798_v28 = vpop.xlane.xlu1 %797 }
 0x325   : > { %1246 = vrcp.f32 %v798_v28  ;;  %v832_v34 = vand.u32 2147483648, %v798_v28  ;;  %v830_v36 = vand.u32 2147483647, %v798_v28  ;;  %vm826_vm12 = vweird.f32 %v798_v28 }
 0x327   : > { %v833_v39 = vor.u32 1.1754944e-38, %v832_v34  ;;  %vm831_vm14 = vcmp.eq.f32.partialorder %v830_v36, 8.507059e+37 }
 0x32b   : > { %v1247_v30 = vpop.eup %1246 }
 0x32c   : > { %v822_v29 = vmul.f32 %v1247_v30, %v798_v28  ;;  %v718_v31 = vpop.xlane.xlu1 %717  ;;  %vm827_vm11 = vweird.f32 %v1247_v30 }
 0x32d   : > { %1248 = vrcp.f32 %v718_v31  ;;  %vm828_vm13 = vmor %vm826_vm12, %vm827_vm11  ;;  %v752_v46 = vand.u32 2147483648, %v718_v31  ;;  %v750_v50 = vand.u32 2147483647, %v718_v31  ;;  %vm746_vm1 = vweird.f32 %v718_v31 }
 0x32e   : > { %v823_v32 = vsub.f32 1.0, %v822_v29  ;;  %vm681_vm11 = vcmask 158848   ;;  %vm761_vm12 = vcmask 191648  }
 0x32f   : > { %v817_v33 = vpop.f32.mrf.mxu1  ;;  %v753_v53 = vor.u32 1.1754944e-38, %v752_v46  ;;  %vm751_vm3 = vcmp.eq.f32.partialorder %v750_v50, 8.507059e+37 }
 0x330   : > { %v824_v35 = vmul.f32 %v1247_v30, %v823_v32 }
 0x332   : > { %v825_v37 = vadd.f32 %v1247_v30, %v824_v35 }
 0x333   : > { %v1249_v38 = vpop.eup %1248 }
 0x334   : > { %v742_v40 = vmul.f32 %v1249_v38, %v718_v31  ;;  %v829_v41 = vsel %vm828_vm13, %v1247_v30, %v825_v37  ;;  %v878_v42 = vpop.xlane.xlu1 %877  ;;  %vm747_vm15 = vweird.f32 %v1249_v38  ;;  %vm841_vm13 = vcmask 224448  }
 0x335   : > { %v834_v43 = vsel %vm831_vm14, %v833_v39, %v829_v41  ;;  %1250 = vrcp.f32 %v878_v42  ;;  %vm748_vm2 = vmor %vm746_vm1, %vm747_vm15  ;;  %v912_v59 = vand.u32 2147483648, %v878_v42  ;;  %v910_v62 = vand.u32 2147483647, %v878_v42 }
 0x336   : > { %v743_v44 = vsub.f32 1.0, %v742_v40  ;;  %v835_v45 = vmul.f32 %v834_v43, %v817_v33  ;;  %vm906_vm5 = vweird.f32 %v878_v42  ;;  %vm921_vm14 = vcmask 257248  }
 0x337   : > { %v819_v47 = vpop.f32.mrf.mxu1  ;;  %v913_v0 = vor.u32 1.1754944e-38, %v912_v59  ;;  %vm911_vm7 = vcmp.eq.f32.partialorder %v910_v62, 8.507059e+37 }
 0x338   : > { %v744_v48 = vmul.f32 %v1249_v38, %v743_v44  ;;  %v836_v49 = vpack.c.bf16 %v835_v45, %v835_v45 }
 0x33a   : > { %838 = vrot.lane.b32.xlu0 %v836_v49, %s1445_s25  ;;  %v745_v51 = vadd.f32 %v1249_v38, %v744_v48 }
 0x33b   : > { %v1251_v52 = vpop.eup %1250 }
 0x33c   : > { %v902_v54 = vmul.f32 %v1251_v52, %v878_v42  ;;  %v749_v55 = vsel %vm748_vm2, %v1249_v38, %v745_v51  ;;  %vm907_vm4 = vweird.f32 %v1251_v52 }
 0x33d   : > { %v754_v56 = vsel %vm751_vm3, %v753_v53, %v749_v55  ;;  %vm908_vm6 = vmor %vm906_vm5, %vm907_vm4 }
 0x33e   : > { %v903_v57 = vsub.f32 1.0, %v902_v54  ;;  %v755_v58 = vmul.f32 %v754_v56, %v737_v21 }
 0x340   : > { %v904_v60 = vmul.f32 %v1251_v52, %v903_v57  ;;  %v756_v61 = vpack.c.bf16 %v755_v58, %v755_v58 }
 0x342   : > { %758 = vrot.lane.b32.xlu1 %v756_v61, %s1446_s12  ;;  %v905_v63 = vadd.f32 %v1251_v52, %v904_v60  ;;  %v519_v6 = vpop.permute.xlu0 %518  ;;  %s1362_s12 = scalar_lea.hbm %s1722_s4, 16 }
 0x343   : > { %v599_v7 = vpop.permute.xlu2 %598  ;;  %p1364_p7 = scmp.lt.s32.totalorder %s1362_s12, %s1358_s21 }
 0x344   : > { %v909_v1 = vsel %vm908_vm6, %v1251_v52, %v905_v63 }
 0x345   : > { %v914_v2 = vsel %vm911_vm7, %v913_v0, %v909_v1  ;;  %p1365_p8 = por %p1364_p7, %p1363_p12 }
 0x346   : > { %v915_v3 = vmul.f32 %v914_v2, %v897_v27 }
 0x347   : > { %p1366_p9 = pnand %p1365_p8, %p1361_p5 }
 0x348   : > { %v916_v4 = vpack.c.bf16 %v915_v3, %v915_v3 }
 0x34a   : > { %918 = vrot.lane.b32.xlu1 %v916_v4, %s1447_s26 }
 0x34c   : > { %v439_v5 = vpop.permute.xlu1 %438 }
 0x34d   : > { %442 = vst.msk [vmem:[#allocation3] sm:$0xf] %vm441_vm8, %v439_v5 }
 0x34e   : > { %522 = vst.msk [vmem:[#allocation3] sm:$0xf] %vm521_vm9, %v519_v6 }
 0x34f   : > { %602 = vst.msk [vmem:[#allocation3] sm:$0xf] %vm601_vm10, %v599_v7 }
 0x379   : > { %v679_v8 = vpop.permute.xlu0 %678 }
 0x37a   : > { %682 = vst.msk [vmem:[#allocation3] sm:$0xf] %vm681_vm11, %v679_v8 }
 0x3ac   : > { %v839_v13 = vpop.permute.xlu0 %838 }
 0x3b4   : > { %v759_v12 = vpop.permute.xlu1 %758 }
 0x3b5   : > { %762 = vst.msk [vmem:[#allocation3] sm:$0xf] %vm761_vm12, %v759_v12 }
 0x3b6   : > { %842 = vst.msk [vmem:[#allocation3] sm:$0xf] %vm841_vm13, %v839_v13 }
 0x3bc   : > { %v919_v14 = vpop.permute.xlu1 %918 }
 0x3bd   : > { %922 = vst.msk [vmem:[#allocation3] sm:$0xf] %vm921_vm14, %v919_v14 }
 0x3c4   : > { %v923_v15 = vld [vmem:[#allocation3] sm:$0xf] }
 0x3c5   : > { %1111 = vmatmul.msk.bf16.vlgmr.msra.gmra.mxu0 %vm266_vm0, %v923_v15 }
 0x442   : > { %v956_v9 = vpop.f32.mrf.mxu0 }
 0x443   : > { %v957_v17 = vadd.f32 %v1219_v16, %v956_v9 }
 0x445   : > { %960 = vst.msk [vmem:[%s247_s6] sm:$0xff] %vm266_vm0, %v957_v17 }
 0x446   : > { %1369 = shalt.err (!%p1366_p9)
}
 0x447   : > { %1130 = dma.vmem_to_hbm [thread:$0]  (%p1542_p4), %s975_s7, 128, %s977_s9, %s962_s22  }
 0x44a   : > { %v958_v18 = vpop.f32.mrf.mxu0 }
 0x44b PF: > { %s988_s14 = sand.u32 1, %s1400_s15   ;;  %p1729_p10 = scmp.ge.s32.totalorder %s1412_s18, 2 }
 0x44c   : > { %s989_s28 = scalar_lea.sflag [#allocation6], %s988_s14 }
 0x44d   : > { %p1144_p13 = pnand %p1729_p10, %p1546_p6 }
 0x44f   : > { %p1145_p11 = pneg %p1144_p13 }
 0x451   : > { %1395 = dma.done.wait (%p1145_p11), %s989_s28, 128  }
 0x452   : > { %1397 = vsyncadd (%p1145_p11), %s989_s28, 4294967168  ;;  %p18_p0 = scmp.ge.s32.totalorder %s1516_s8, 4   ;;  %s1730_s15 = smov %s1404_s16 }
 0x453   : > { %s1731_s16 = smov %s1408_s17  ;;  %s1732_s17 = smov %s1527_s11 }
 0x454   : > { %s1733_s18 = smov %s1516_s8  ;;  %20 = sbr.rel (!%p18_p0) target bundleno = 6 (0x6), region = 89 }
 0x459   :  { %995 = vsyncpa [#allocation5], 1 }
 0x45a   :  { %997 = vsyncpa [#allocation5 + $0x1], 1 }
 0x45b   :  { %998 = vsyncpa [#allocation8], 1 }
 0x45c   :  { %999 = vsyncpa [#allocation6], 1 }
 0x45d   :  { %1001 = vsyncpa [#allocation6 + $0x1], 1 }

</bundles_post_ra>
